<compile_context>
chip_gen: v5e
topology: v5e:2x2
jax: 0.10.0
libtpu: 0.0.40
codegen_flags: <defaults>
</compile_context>

<pallas_src>
import jax
import jax.numpy as jnp
from jax import lax
from jax.experimental import pallas as pl
from jax.experimental.pallas import tpu as pltpu

NUM_CLASSES = 7
C_IN, C_OUT, K = 3, 32, 3
H = W = 2                      # forced by Linear(32, num_classes) after flatten
HW = H * W                     # 4 conv output positions
FEAT = C_IN * H * W            # 12 raw input features per sample (NCHW flattened)
LANE = HW * C_OUT              # 128: 4 positions x 32 channels, lane-dense
BN_EPS = 1e-5


def _model_kernel(x_ref, wcat_ref, bconv_ref, scale_ref, shift_ref,
                  wlin_ref, blin_ref, out_ref):
    """One batch tile.

    x_ref:    (BT, 12)   raw NCHW-flattened input
    wcat_ref: (12, 128)  per-position conv weights, positions stacked along lanes
    b/scale/shift: (1, 128) conv bias / folded BN affine, tiled over the 4 positions
    wlin_ref: (128, 128) classifier weight (rows >= 32 and cols >= 7 are zero)
    out_ref:  (BT, 128)  lane-dense output; cols [0:NUM_CLASSES] are the logits
    """
    # Conv for all 4 output positions in a single MXU call.
    y = jnp.dot(x_ref[...], wcat_ref[...], preferred_element_type=jnp.float32)
    y = jnp.maximum(y + bconv_ref[...], 0.0)            # conv bias + ReLU
    y = y * scale_ref[...] + shift_ref[...]             # BatchNorm2d (eval, folded)
    # MaxPool2d(2,2): max over the 4 position groups of 32 lanes (XLU rolls, no slices).
    m = jnp.maximum(y, pltpu.roll(y, shift=2 * C_OUT, axis=1))
    m = jnp.maximum(m, pltpu.roll(m, shift=C_OUT, axis=1))
    # Lanes [0:32] of m hold the pooled features; other lanes hit zero rows of wlin.
    out_ref[...] = jnp.dot(m, wlin_ref[...],
                           preferred_element_type=jnp.float32) + blin_ref[...]


def _cdiv(a, b):
    return -(-a // b)


def _pick_tiling(B, target=4096):
    n_tiles = _cdiv(B, target)
    if B >= 2048:
        n_tiles = max(n_tiles, 2)        # v7x: give the 'parallel' grid >= 2 steps (2 TCs)
    bt = max(8, _cdiv(_cdiv(B, n_tiles), 8) * 8)   # divisor-friendly, sublane aligned
    return bt, n_tiles


def custom_model_forward(x, params):
    """x: (B, 3, 2, 2) float32, PyTorch NCHW layout. Returns (B, NUM_CLASSES)."""
    B, cin, h, w = x.shape
    assert cin == C_IN and h == H and w == W, "Linear(32, num_classes) requires 2x2 input"

    # Raw input, no im2col: NCHW flatten is a free contiguous reshape.
    xflat = x.reshape(B, FEAT)                       # row index = cin*4 + ih*2 + iw

    bt, n_tiles = _pick_tiling(B)
    B_pad = bt * n_tiles
    if B_pad != B:
        xflat = jnp.pad(xflat, ((0, B_pad - B), (0, 0)))

    # Per-output-position conv weights (padding taps vanish on a 2x2 input), stacked
    # along N into one lane-dense (12, 128) operand.  Row order matches xflat.
    wconv = params["conv_w"]                         # (Cout, Cin, Kh, Kw), OIHW
    blocks = []
    for oh in range(H):
        for ow in range(W):
            sub = wconv[:, :, 1 - oh:K - oh, 1 - ow:K - ow]          # (Cout, Cin, 2, 2)
            blocks.append(jnp.transpose(sub, (1, 2, 3, 0)).reshape(FEAT, C_OUT))
    wcat = jnp.concatenate(blocks, axis=1)           # (12, 128)

    # Conv bias + exact BatchNorm pre-fold (eval mode / running stats), tiled per position.
    # TODO(synk): PyTorch training-mode batch statistics are not reproduced.
    scale = params["bn_gamma"] * lax.rsqrt(params["bn_var"] + BN_EPS)
    shift = params["bn_beta"] - params["bn_mean"] * scale
    tile = lambda v: jnp.tile(v, HW).reshape(1, LANE)

    # Classifier, zero-padded so the kernel output block is lane-dense (128 wide).
    wlin = jnp.zeros((LANE, LANE), jnp.float32).at[:C_OUT, :NUM_CLASSES].set(
        params["lin_w"].T)
    blin = jnp.zeros((1, LANE), jnp.float32).at[0, :NUM_CLASSES].set(params["lin_b"])

    out = pl.pallas_call(
        _model_kernel,
        out_shape=jax.ShapeDtypeStruct((B_pad, LANE), jnp.float32),
        grid=(n_tiles,),
        in_specs=[
            pl.BlockSpec((bt, FEAT), lambda i: (i, 0)),    # raw input (batch-tiled)
            pl.BlockSpec((FEAT, LANE), lambda i: (0, 0)),  # conv W (all 4 positions)
            pl.BlockSpec((1, LANE), lambda i: (0, 0)),     # conv bias (tiled)
            pl.BlockSpec((1, LANE), lambda i: (0, 0)),     # bn scale (folded, tiled)
            pl.BlockSpec((1, LANE), lambda i: (0, 0)),     # bn shift (folded, tiled)
            pl.BlockSpec((LANE, LANE), lambda i: (0, 0)),  # linear W (zero-padded)
            pl.BlockSpec((1, LANE), lambda i: (0, 0)),     # linear b (zero-padded)
        ],
        out_specs=pl.BlockSpec((bt, LANE), lambda i: (i, 0)),
        compiler_params=pltpu.CompilerParams(
            dimension_semantics=("parallel",),
            vmem_limit_bytes=48 * 1024 * 1024),            # fits v7x's 64 MiB VMEM
    )(xflat, wcat, tile(params["conv_b"]), tile(scale), tile(shift), wlin, blin)

    # Padded batch rows / lanes carry bias garbage; slice them off here.
    return out[:B, :NUM_CLASSES]


def reference_forward(x, params):
    """Pure-JAX reference of the same (eval-mode) forward pass, NCHW."""
    y = lax.conv_general_dilated(x, params["conv_w"], (1, 1), ((1, 1), (1, 1)),
                                 dimension_numbers=("NCHW", "OIHW", "NCHW"),
                                 precision=lax.Precision.HIGHEST)
    y = y + params["conv_b"][None, :, None, None]
    y = jnp.maximum(y, 0.0)
    scale = params["bn_gamma"] / jnp.sqrt(params["bn_var"] + BN_EPS)
    y = (y - params["bn_mean"][None, :, None, None]) * scale[None, :, None, None] \
        + params["bn_beta"][None, :, None, None]
    y = lax.reduce_window(y, -jnp.inf, lax.max, (1, 1, 2, 2), (1, 1, 2, 2), "VALID")
    y = y.reshape(y.shape[0], -1)
    return jnp.dot(y, params["lin_w"].T,
                   precision=lax.Precision.HIGHEST) + params["lin_b"][None, :]


if __name__ == "__main__":
    key = jax.random.PRNGKey(0)
    ks = jax.random.split(key, 9)
    params = {
        "conv_w": 0.1 * jax.random.normal(ks[0], (C_OUT, C_IN, K, K), jnp.float32),
        "conv_b": 0.1 * jax.random.normal(ks[1], (C_OUT,), jnp.float32),
        "bn_gamma": 1.0 + 0.1 * jax.random.normal(ks[2], (C_OUT,), jnp.float32),
        "bn_beta": 0.1 * jax.random.normal(ks[3], (C_OUT,), jnp.float32),
        "bn_mean": 0.1 * jax.random.normal(ks[4], (C_OUT,), jnp.float32),
        "bn_var": jax.random.uniform(ks[5], (C_OUT,), jnp.float32, 0.5, 1.5),
        "lin_w": 0.1 * jax.random.normal(ks[6], (NUM_CLASSES, C_OUT), jnp.float32),
        "lin_b": 0.1 * jax.random.normal(ks[7], (NUM_CLASSES,), jnp.float32),
    }
    x = jax.random.normal(ks[8], (2, C_IN, H, W), jnp.float32)   # NCHW input

    fwd = jax.jit(custom_model_forward)
    out = jax.block_until_ready(fwd(x, params))
    ref = reference_forward(x, params)

    assert out.shape == (2, NUM_CLASSES), out.shape
    assert jnp.allclose(out, ref, rtol=1e-4, atol=1e-4), (out, ref)
    print("KERNEL_OK")
</pallas_src>

<mosaic_0001>
module attributes {stable_mosaic.version = 11 : i64} {
  func.func @_model_kernel(%arg0: i32, %arg1: memref<8x12xf32, #tpu.memory_space<vmem>>, %arg2: memref<12x128xf32, #tpu.memory_space<vmem>>, %arg3: memref<1x128xf32, #tpu.memory_space<vmem>>, %arg4: memref<1x128xf32, #tpu.memory_space<vmem>>, %arg5: memref<1x128xf32, #tpu.memory_space<vmem>>, %arg6: memref<128x128xf32, #tpu.memory_space<vmem>>, %arg7: memref<1x128xf32, #tpu.memory_space<vmem>>, %arg8: memref<8x128xf32, #tpu.memory_space<vmem>>) attributes {dimension_semantics = [#tpu.dimension_semantics<parallel>], iteration_bounds = array<i64: 1>, scalar_prefetch = 0 : i64, scratch_operands = 0 : i64, tpu.core_type = #tpu.core_type<tc>, window_params = [{transform_indices = @transform_0, window_bounds = array<i64: 8, 12>}, {pipeline_mode = #tpu.pipeline_mode<synchronous>, transform_indices = @transform_1, window_bounds = array<i64: 12, 128>}, {pipeline_mode = #tpu.pipeline_mode<synchronous>, transform_indices = @transform_2, window_bounds = array<i64: 1, 128>}, {pipeline_mode = #tpu.pipeline_mode<synchronous>, transform_indices = @transform_3, window_bounds = array<i64: 1, 128>}, {pipeline_mode = #tpu.pipeline_mode<synchronous>, transform_indices = @transform_4, window_bounds = array<i64: 1, 128>}, {pipeline_mode = #tpu.pipeline_mode<synchronous>, transform_indices = @transform_5, window_bounds = array<i64: 128, 128>}, {pipeline_mode = #tpu.pipeline_mode<synchronous>, transform_indices = @transform_6, window_bounds = array<i64: 1, 128>}, {transform_indices = @transform_7, window_bounds = array<i64: 8, 128>}]} {
    %c0 = arith.constant 0 : index
    %c0_0 = arith.constant 0 : index
    %0 = vector.load %arg1[%c0, %c0_0] : memref<8x12xf32, #tpu.memory_space<vmem>>, vector<8x12xf32>
    %c0_1 = arith.constant 0 : index
    %c0_2 = arith.constant 0 : index
    %1 = vector.load %arg2[%c0_1, %c0_2] : memref<12x128xf32, #tpu.memory_space<vmem>>, vector<12x128xf32>
    %cst = arith.constant dense<0.000000e+00> : vector<8x128xf32>
    %2 = tpu.matmul %0, %1, %cst {dimension_numbers = #tpu.dot_dimension_numbers<[1], [0], [0], [1], [0, 0, 1, 1], [], []>} : vector<8x12xf32>, vector<12x128xf32>, vector<8x128xf32> -> vector<8x128xf32>
    %c0_3 = arith.constant 0 : index
    %c0_4 = arith.constant 0 : index
    %3 = vector.load %arg3[%c0_3, %c0_4] : memref<1x128xf32, #tpu.memory_space<vmem>>, vector<1x128xf32>
    %4 = vector.broadcast %3 : vector<1x128xf32> to vector<8x128xf32>
    %5 = arith.addf %2, %4 : vector<8x128xf32>
    %cst_5 = arith.constant 0.000000e+00 : f32
    %6 = vector.broadcast %cst_5 : f32 to vector<8x128xf32>
    %7 = arith.maximumf %5, %6 : vector<8x128xf32>
    %c0_6 = arith.constant 0 : index
    %c0_7 = arith.constant 0 : index
    %8 = vector.load %arg4[%c0_6, %c0_7] : memref<1x128xf32, #tpu.memory_space<vmem>>, vector<1x128xf32>
    %9 = vector.broadcast %8 : vector<1x128xf32> to vector<8x128xf32>
    %10 = arith.mulf %7, %9 : vector<8x128xf32>
    %c0_8 = arith.constant 0 : index
    %c0_9 = arith.constant 0 : index
    %11 = vector.load %arg5[%c0_8, %c0_9] : memref<1x128xf32, #tpu.memory_space<vmem>>, vector<1x128xf32>
    %12 = vector.broadcast %11 : vector<1x128xf32> to vector<8x128xf32>
    %13 = arith.addf %10, %12 : vector<8x128xf32>
    %c64_i32 = arith.constant 64 : i32
    %14 = tpu.dynamic_rotate %13 by %c64_i32 dim 1 : vector<8x128xf32>, i32 -> vector<8x128xf32>
    %15 = arith.maximumf %13, %14 : vector<8x128xf32>
    %c32_i32 = arith.constant 32 : i32
    %16 = tpu.dynamic_rotate %15 by %c32_i32 dim 1 : vector<8x128xf32>, i32 -> vector<8x128xf32>
    %17 = arith.maximumf %15, %16 : vector<8x128xf32>
    %c0_10 = arith.constant 0 : index
    %c0_11 = arith.constant 0 : index
    %18 = vector.load %arg6[%c0_10, %c0_11] : memref<128x128xf32, #tpu.memory_space<vmem>>, vector<128x128xf32>
    %cst_12 = arith.constant dense<0.000000e+00> : vector<8x128xf32>
    %19 = tpu.matmul %17, %18, %cst_12 {dimension_numbers = #tpu.dot_dimension_numbers<[1], [0], [0], [1], [0, 0, 1, 1], [], []>} : vector<8x128xf32>, vector<128x128xf32>, vector<8x128xf32> -> vector<8x128xf32>
    %c0_13 = arith.constant 0 : index
    %c0_14 = arith.constant 0 : index
    %20 = vector.load %arg7[%c0_13, %c0_14] : memref<1x128xf32, #tpu.memory_space<vmem>>, vector<1x128xf32>
    %21 = vector.broadcast %20 : vector<1x128xf32> to vector<8x128xf32>
    %22 = arith.addf %19, %21 : vector<8x128xf32>
    %c0_15 = arith.constant 0 : index
    %c0_16 = arith.constant 0 : index
    %23 = vector.load %arg8[%c0_15, %c0_16] : memref<8x128xf32, #tpu.memory_space<vmem>>, vector<8x128xf32>
    tpu.vector_store %arg8[%c0_15, %c0_16], %22 {strides = array<i32>} : memref<8x128xf32, #tpu.memory_space<vmem>>, vector<8x128xf32>,
    return
  }
  func.func @transform_0(%arg0: i32) -> (i32, i32) {
    %c0_i32 = arith.constant 0 : i32
    %c0_i32_0 = arith.constant 0 : i32
    return %arg0, %c0_i32 : i32, i32
  }
  func.func @transform_1(%arg0: i32) -> (i32, i32) {
    %c0_i32 = arith.constant 0 : i32
    %c0_i32_0 = arith.constant 0 : i32
    %c0_i32_1 = arith.constant 0 : i32
    return %c0_i32, %c0_i32_0 : i32, i32
  }
  func.func @transform_2(%arg0: i32) -> (i32, i32) {
    %c0_i32 = arith.constant 0 : i32
    %c0_i32_0 = arith.constant 0 : i32
    %c0_i32_1 = arith.constant 0 : i32
    return %c0_i32, %c0_i32_0 : i32, i32
  }
  func.func @transform_3(%arg0: i32) -> (i32, i32) {
    %c0_i32 = arith.constant 0 : i32
    %c0_i32_0 = arith.constant 0 : i32
    %c0_i32_1 = arith.constant 0 : i32
    return %c0_i32, %c0_i32_0 : i32, i32
  }
  func.func @transform_4(%arg0: i32) -> (i32, i32) {
    %c0_i32 = arith.constant 0 : i32
    %c0_i32_0 = arith.constant 0 : i32
    %c0_i32_1 = arith.constant 0 : i32
    return %c0_i32, %c0_i32_0 : i32, i32
  }
  func.func @transform_5(%arg0: i32) -> (i32, i32) {
    %c0_i32 = arith.constant 0 : i32
    %c0_i32_0 = arith.constant 0 : i32
    %c0_i32_1 = arith.constant 0 : i32
    return %c0_i32, %c0_i32_0 : i32, i32
  }
  func.func @transform_6(%arg0: i32) -> (i32, i32) {
    %c0_i32 = arith.constant 0 : i32
    %c0_i32_0 = arith.constant 0 : i32
    %c0_i32_1 = arith.constant 0 : i32
    return %c0_i32, %c0_i32_0 : i32, i32
  }
  func.func @transform_7(%arg0: i32) -> (i32, i32) {
    %c0_i32 = arith.constant 0 : i32
    %c0_i32_0 = arith.constant 0 : i32
    return %arg0, %c0_i32 : i32, i32
  }
}

</mosaic_0001>

<bundles_post_ra>
// kernel: tile.24
= control target key start
LH: loop header
LB: loop body
LE: loop exit
PB: predicated region body
PF: predicated region fallthrough
CT: control target
= control target key end

     0   :  { %s37_s8 = smov 32   ;;  %s38_s9 = smov 64   ;;  %vm7_vm0 = vcmask 261120   ;;  %vm13_vm1 = vcmask 1048320   ;;  %vm19_vm2 = vcmask 785920   ;;  %vm25_vm3 = vcmask 523520   ;;  %s55_s0 = inlined_call_operand.vmem [shape: f32[4,32], index: 0, kind: input, shape index: {}]   ;;  %s56_s1 = inlined_call_operand.vmem [shape: f32[1,128], index: 1, kind: output, shape index: {}]  }
   0x1   :  { %v4_v0 = vld [vmem:[%s55_s0] sm:$0xf]  ;;  %s36_s0 = smov 96  }
   0x2   :  { %5 = vst [vmem:[#allocation1] sm:$0xf] %v4_v0 }
   0x9   :  { %v10_v1 = vld [vmem:[#allocation1 + $0x3] sm:$0x1]   ;;  %v22_v2 = vld [vmem:[#allocation1 + $0x1] sm:$0x1]   ;;  %v16_v3 = vld [vmem:[#allocation1 + $0x2] sm:$0x1]  }
   0xa   :  { %11 = vrot.lane.b32.xlu0 %v10_v1, %s36_s0  ;;  %23 = vrot.lane.b32.xlu1 %v22_v2, %s37_s8  ;;  %v6_v4 = vld [vmem:[#allocation1] sm:$0x1]  }
   0xb   :  { %8 = vst.msk [vmem:[#allocation0] sm:$0x1] %vm7_vm0, %v6_v4  }
  0x12   :  { %17 = vrot.lane.b32.xlu0 %v16_v3, %s38_s9 }
  0x7c   :  { %v12_v5 = vpop.permute.xlu0 %11   ;;  %v24_v6 = vpop.permute.xlu1 %23  }
  0x7d   :  { %14 = vst.msk [vmem:[#allocation0] sm:$0x1] %vm13_vm1, %v12_v5  }
  0x84   :  { %v18_v7 = vpop.permute.xlu0 %17  }
  0x85   :  { %20 = vst.msk [vmem:[#allocation0] sm:$0x1] %vm19_vm2, %v18_v7  }
  0x86   :  { %26 = vst.msk [vmem:[#allocation0] sm:$0x1] %vm25_vm3, %v24_v6  }
  0x8d   :  { %v29_v8 = vld [vmem:[#allocation0] sm:$0x1] }
  0x8e   :  { %32 = vst [vmem:[%s56_s1] sm:$0x1] %v29_v8 }

// kernel: tile.23
= control target key start
LH: loop header
LB: loop body
LE: loop exit
PB: predicated region body
PF: predicated region fallthrough
CT: control target
= control target key end

     0   :  { %s22_s0 = inlined_call_operand.vmem [shape: f32[32], index: 0, kind: input, shape index: {}]   ;;  %s23_s1 = inlined_call_operand.vmem [shape: f32[4,32], index: 1, kind: output, shape index: {}]  }
   0x1   :  { %v4_v0 = vld [vmem:[%s22_s0] ss:$0 sm:$0xff] }
   0x2   :  { %5 = vst [vmem:[%s23_s1] sm:$0xf] %v4_v0 }

// kernel: custom_model_forward.1
= control target key start
LH: loop header
LB: loop body
LE: loop exit
PB: predicated region body
PF: predicated region fallthrough
CT: control target
= control target key end

     0   :  { %vm37_vm0 = vcmask 1043456   ;;  %vm33_vm1 = vcmask 97280   ;;  %s245_s1 = inlined_call_operand.vmem [shape: f32[12,128], index: 1, kind: input, shape index: {}]   ;;  %s246_s0 = inlined_call_operand.vmem [shape: f32[8,12], index: 0, kind: input, shape index: {}]   ;;  %s247_s2 = inlined_call_operand.vmem [shape: f32[1,128], index: 2, kind: input, shape index: {}]   ;;  %s248_s3 = inlined_call_operand.vmem [shape: f32[1,128], index: 3, kind: input, shape index: {}]   ;;  %s249_s4 = inlined_call_operand.vmem [shape: f32[1,128], index: 4, kind: input, shape index: {}]   ;;  %s250_s5 = inlined_call_operand.vmem [shape: f32[128,128], index: 5, kind: input, shape index: {}]   ;;  %s251_s6 = inlined_call_operand.vmem [shape: f32[1,128], index: 6, kind: input, shape index: {}]   ;;  %s252_s7 = inlined_call_operand.vmem [shape: f32[8,128], index: 7, kind: output, shape index: {}]  }
   0x1   :  { %v28_v0 = vld [vmem:[%s245_s1 + $0x8] sm:$0xf]  ;;  %v27_v1 = vld [vmem:[%s245_s1] sm:$0xff]  ;;  %v93_v11 = vld [vmem:[%s250_s5 + $0x78] sm:$0xff] }
   0x2   :  { %123 = vmatpush.msk.msra.mxu0 %vm37_vm0, %v28_v0  ;;  %v26_v2 = vld [vmem:[%s246_s0] sm:$0xff]  ;;  %s131_s0 = smov 64   ;;  %v92_v12 = vld [vmem:[%s250_s5 + $0x70] sm:$0xff]  ;;  %98 = vmatpush.msra.mxu1 %v93_v11  ;;  %v91_v13 = vld [vmem:[%s250_s5 + $0x68] sm:$0xff] }
   0x3   :  { %v127_v3 = vld [vmem:[%s247_s2] ss:$0 sm:$0xff]  ;;  %v89_v15 = vld [vmem:[%s250_s5 + $0x58] sm:$0xff]  ;;  %v88_v16 = vld [vmem:[%s250_s5 + $0x50] sm:$0xff]  ;;  %s132_s2 = smov 32  }
   0x4   :  { %56 = vmatpush.msra.mxu0 %v27_v1  ;;  %v128_v6 = vld [vmem:[%s248_s3] ss:$0 sm:$0xff]  ;;  %99 = vmatpush.msra.mxu1 %v92_v12  ;;  %v87_v17 = vld [vmem:[%s250_s5 + $0x48] sm:$0xff]  ;;  %v85_v19 = vld [vmem:[%s250_s5 + $0x38] sm:$0xff] }
   0x5   :  { %124 = vmatmul.msk.f32.vlgmr.msra.gmra.mxu0 %vm33_vm1, %v26_v2  ;;  %v129_v8 = vld [vmem:[%s249_s4] ss:$0 sm:$0xff]  ;;  %v84_v20 = vld [vmem:[%s250_s5 + $0x30] sm:$0xff]  ;;  %v83_v21 = vld [vmem:[%s250_s5 + $0x28] sm:$0xff] }
   0x6   :  { %v90_v14 = vld [vmem:[%s250_s5 + $0x60] sm:$0xff]  ;;  %100 = vmatpush.msra.mxu1 %v91_v13  ;;  %v81_v23 = vld [vmem:[%s250_s5 + $0x18] sm:$0xff]  ;;  %v80_v24 = vld [vmem:[%s250_s5 + $0x10] sm:$0xff] }
   0x7   :  { %v86_v18 = vld [vmem:[%s250_s5 + $0x40] sm:$0xff]  ;;  %v79_v25 = vld [vmem:[%s250_s5 + $0x8] sm:$0xff] }
   0x8   :  { %101 = vmatpush.msra.mxu1 %v90_v14  ;;  %v82_v22 = vld [vmem:[%s250_s5 + $0x20] sm:$0xff] }
   0x9   :  { %v78_v28 = vld [vmem:[%s250_s5] sm:$0xff] }
   0xa   :  { %102 = vmatpush.msra.mxu1 %v89_v15  ;;  %v130_v31 = vld [vmem:[%s251_s6] ss:$0 sm:$0xff] }
   0xc   :  { %103 = vmatpush.msra.mxu1 %v88_v16 }
   0xe   :  { %104 = vmatpush.msra.mxu1 %v87_v17 }
  0x10   :  { %105 = vmatpush.msra.mxu1 %v86_v18 }
  0x12   :  { %106 = vmatpush.msra.mxu1 %v85_v19 }
  0x14   :  { %107 = vmatpush.msra.mxu1 %v84_v20 }
  0x16   :  { %108 = vmatpush.msra.mxu1 %v83_v21 }
  0x18   :  { %109 = vmatpush.msra.mxu1 %v82_v22 }
  0x1a   :  { %110 = vmatpush.msra.mxu1 %v81_v23 }
  0x1c   :  { %111 = vmatpush.msra.mxu1 %v80_v24 }
  0x1e   :  { %112 = vmatpush.msra.mxu1 %v79_v25 }
  0x20   :  { %113 = vmatpush.msra.mxu1 %v78_v28 }
  0x82   :  { %v58_v4 = vpop.f32.mrf.mxu0 }
  0x83   :  { %v59_v5 = vadd.f32 %v127_v3, %v58_v4 }
  0x85   :  { %v61_v7 = vmax.f32 %v59_v5, 0.0 }
  0x87   :  { %v66_v9 = vmul.f32 %v128_v6, %v61_v7 }
  0x89   :  { %v71_v10 = vadd.f32 %v129_v8, %v66_v9 }
  0x8b   :  { %72 = vrot.lane.b32.xlu0 %v71_v10, %s131_s0 }
  0xfd   :  { %v73_v26 = vpop.permute.xlu0 %72 }
  0xfe   :  { %v74_v27 = vmax.f32 %v71_v10, %v73_v26 }
 0x100   :  { %75 = vrot.lane.b32.xlu0 %v74_v27, %s132_s2 }
 0x172   :  { %v76_v29 = vpop.permute.xlu0 %75 }
 0x173   :  { %v77_v30 = vmax.f32 %v74_v27, %v76_v29 }
 0x175   :  { %114 = vmatmul.f32.vlgmr.msra.gmra.mxu1 %v77_v30 }
 0x1f2   :  { %v115_v32 = vpop.f32.mrf.mxu1 }
 0x1f3   :  { %v116_v33 = vadd.f32 %v130_v31, %v115_v32 }
 0x1f5   :  { %118 = vst [vmem:[%s252_s7] sm:$0xff] %v116_v33 }

</bundles_post_ra>
